<compile_context>
chip_gen: v7x
topology: tpu7x:2x2x1
jax: 0.10.0
libtpu: 0.0.40
codegen_flags: <defaults>
</compile_context>

<pallas_src>
import math

import jax
import jax.numpy as jnp
from jax.experimental import pallas as pl
from jax.experimental.pallas import tpu as pltpu


def _round_up(x, m):
    return ((x + m - 1) // m) * m


def _make_kernel(scale, lk_actual, lk_padded, tk):
    masking = lk_padded != lk_actual

    def kernel(q_ref, k_ref, v_ref, o_ref, m_sc, l_sc, acc_sc):
        kv = pl.program_id(2)

        @pl.when(kv == 0)
        def _():
            m_sc[...] = jnp.full_like(m_sc, -jnp.inf)
            l_sc[...] = jnp.zeros_like(l_sc)
            acc_sc[...] = jnp.zeros_like(acc_sc)

        # Fold 1/sqrt(D) into the (small) q tile; keep MXU inputs native dtype.
        q = q_ref[0] * scale                 # (tq, Dp)
        k = k_ref[0]                         # (tk, Dp)
        v = v_ref[0]                         # (tk, Dvp)

        # scores = q @ k^T without an explicit transpose: contract last dims.
        s = jax.lax.dot_general(
            q, k, (((1,), (1,)), ((), ())),
            preferred_element_type=jnp.float32)          # (tq, tk) f32

        if masking:
            col = kv * tk + jax.lax.broadcasted_iota(jnp.int32, s.shape, 1)
            s = jnp.where(col < lk_actual, s, -jnp.inf)

        # online softmax update
        m_prev = m_sc[...]
        m_new = jnp.maximum(m_prev, jnp.max(s, axis=-1, keepdims=True))
        alpha = jnp.exp(m_prev - m_new)
        p = jnp.exp(s - m_new)                           # (tq, tk) f32
        l_sc[...] = alpha * l_sc[...] + jnp.sum(p, axis=-1, keepdims=True)
        acc_sc[...] = alpha * acc_sc[...] + jax.lax.dot_general(
            p.astype(v.dtype), v, (((1,), (0,)), ((), ())),
            preferred_element_type=jnp.float32)
        m_sc[...] = m_new

        @pl.when(kv == pl.num_programs(2) - 1)
        def _():
            inv_l = pl.reciprocal(l_sc[...], approx=True)    # EUP, ~free slot
            o_ref[0] = (acc_sc[...] * inv_l).astype(o_ref.dtype)

    return kernel


def dot_attention(query, key, value, *, tq=256, tk=256):
    """Pallas TPU implementation of DotAttention.forward (dropout is a no-op)."""
    B, Lq, D = query.shape
    Bk, Lk, Dk = key.shape
    Bv, Lkv, Dv = value.shape
    assert B == Bk == Bv and D == Dk and Lk == Lkv

    scale = 1.0 / math.sqrt(D)

    # --- pad to (8, 128)-aligned, lane-dense blocks -------------------------
    Dp = _round_up(D, 128)
    Dvp = _round_up(Dv, 128)
    tq_e = min(tq, _round_up(Lq, 8))
    tk_e = min(tk, _round_up(Lk, 8))
    Lq_p = _round_up(Lq, tq_e)
    Lk_p = _round_up(Lk, tk_e)

    qp = jnp.pad(query, ((0, 0), (0, Lq_p - Lq), (0, Dp - D)))
    kp = jnp.pad(key, ((0, 0), (0, Lk_p - Lk), (0, Dp - D)))
    vp = jnp.pad(value, ((0, 0), (0, Lk_p - Lk), (0, Dvp - Dv)))

    grid = (B, Lq_p // tq_e, Lk_p // tk_e)
    kernel = _make_kernel(scale, Lk, Lk_p, tk_e)

    # crude VMEM budget: 2-deep buffering of each block + f32 scratch, with headroom
    isz = jnp.dtype(query.dtype).itemsize
    vmem_est = (2 * isz * (tq_e * Dp + tk_e * Dp + tk_e * Dvp + tq_e * Dvp)
                + 4 * tq_e * (Dvp + 2))
    vmem_limit = int(min(max(4 * vmem_est, 16 * 1024 * 1024), 64 * 1024 * 1024))

    out = pl.pallas_call(
        kernel,
        out_shape=jax.ShapeDtypeStruct((B, Lq_p, Dvp), query.dtype),
        grid_spec=pltpu.PrefetchScalarGridSpec(
            num_scalar_prefetch=0,
            grid=grid,
            in_specs=[
                pl.BlockSpec((1, tq_e, Dp), lambda b, qi, ki: (b, qi, 0)),
                pl.BlockSpec((1, tk_e, Dp), lambda b, qi, ki: (b, ki, 0)),
                pl.BlockSpec((1, tk_e, Dvp), lambda b, qi, ki: (b, ki, 0)),
            ],
            out_specs=pl.BlockSpec((1, tq_e, Dvp), lambda b, qi, ki: (b, qi, 0)),
            scratch_shapes=[
                pltpu.VMEM((tq_e, 1), jnp.float32),     # running max m
                pltpu.VMEM((tq_e, 1), jnp.float32),     # running sum l
                pltpu.VMEM((tq_e, Dvp), jnp.float32),   # output accumulator
            ],
        ),
        compiler_params=pltpu.CompilerParams(
            dimension_semantics=("parallel", "parallel", "arbitrary"),
            vmem_limit_bytes=vmem_limit,
        ),
    )(qp, kp, vp)

    return out[:, :Lq, :Dv]


def _reference(query, key, value):
    d = query.shape[-1]
    w = jnp.einsum("bqd,bkd->bqk", query, key) / math.sqrt(d)
    p = jax.nn.softmax(w, axis=-1)
    return jnp.einsum("bqk,bkv->bqv", p, value)


if __name__ == "__main__":
    # Small shapes consistent with the module: batch=2, seq=8, hidden=32.
    B, Lq, Lk, D, Dv = 2, 8, 8, 32, 32
    key0 = jax.random.PRNGKey(0)
    kq, kk, kv = jax.random.split(key0, 3)
    query = jax.random.normal(kq, (B, Lq, D), dtype=jnp.float32)
    key_ = jax.random.normal(kk, (B, Lk, D), dtype=jnp.float32)
    value = jax.random.normal(kv, (B, Lk, Dv), dtype=jnp.float32)

    out = dot_attention(query, key_, value)
    out = jax.block_until_ready(out)

    ref = _reference(query, key_, value)
    assert out.shape == (B, Lq, Dv)
    # Tolerance loosened slightly vs the exact path because the softmax
    # normalization uses the EUP approximate reciprocal (pl.reciprocal approx=True).
    assert jnp.allclose(out, ref, atol=1e-2, rtol=1e-2), "mismatch vs reference"

    print("KERNEL_OK")
</pallas_src>

<mosaic_0001>
module attributes {stable_mosaic.version = 11 : i64} {
  func.func @kernel(%arg0: i32, %arg1: i32, %arg2: i32, %arg3: memref<1x8x128xf32, #tpu.memory_space<vmem>>, %arg4: memref<1x8x128xf32, #tpu.memory_space<vmem>>, %arg5: memref<1x8x128xf32, #tpu.memory_space<vmem>>, %arg6: memref<1x8x128xf32, #tpu.memory_space<vmem>>, %arg7: memref<8x1xf32, #tpu.memory_space<vmem>>, %arg8: memref<8x1xf32, #tpu.memory_space<vmem>>, %arg9: memref<8x128xf32, #tpu.memory_space<vmem>>) attributes {dimension_semantics = [#tpu.dimension_semantics<parallel>, #tpu.dimension_semantics<parallel>, #tpu.dimension_semantics<arbitrary>], iteration_bounds = array<i64: 2, 1, 1>, scalar_prefetch = 0 : i64, scratch_operands = 3 : i64, tpu.core_type = #tpu.core_type<tc>, window_params = [{transform_indices = @transform_0, window_bounds = array<i64: 1, 8, 128>}, {transform_indices = @transform_1, window_bounds = array<i64: 1, 8, 128>}, {transform_indices = @transform_2, window_bounds = array<i64: 1, 8, 128>}, {transform_indices = @transform_3, window_bounds = array<i64: 1, 8, 128>}]} {
    %c0_i32 = arith.constant 0 : i32
    %0 = arith.cmpi eq, %arg2, %c0_i32 : i32
    %1 = arith.extui %0 : i1 to i32
    %c0_i32_0 = arith.constant 0 : i32
    %2 = arith.cmpi ne, %1, %c0_i32_0 : i32
    scf.if %2 {
      %cst_27 = arith.constant 0xFF800000 : f32
      %37 = vector.broadcast %cst_27 : f32 to vector<8x1xf32>
      %c0_28 = arith.constant 0 : index
      %c0_29 = arith.constant 0 : index
      %38 = vector.load %arg7[%c0_28, %c0_29] : memref<8x1xf32, #tpu.memory_space<vmem>>, vector<8x1xf32>
      tpu.vector_store %arg7[%c0_28, %c0_29], %37 {strides = array<i32>} : memref<8x1xf32, #tpu.memory_space<vmem>>, vector<8x1xf32>,
      %cst_30 = arith.constant 0.000000e+00 : f32
      %39 = vector.broadcast %cst_30 : f32 to vector<8x1xf32>
      %c0_31 = arith.constant 0 : index
      %c0_32 = arith.constant 0 : index
      %40 = vector.load %arg8[%c0_31, %c0_32] : memref<8x1xf32, #tpu.memory_space<vmem>>, vector<8x1xf32>
      tpu.vector_store %arg8[%c0_31, %c0_32], %39 {strides = array<i32>} : memref<8x1xf32, #tpu.memory_space<vmem>>, vector<8x1xf32>,
      %cst_33 = arith.constant 0.000000e+00 : f32
      %41 = vector.broadcast %cst_33 : f32 to vector<8x128xf32>
      %c0_34 = arith.constant 0 : index
      %c0_35 = arith.constant 0 : index
      %42 = vector.load %arg9[%c0_34, %c0_35] : memref<8x128xf32, #tpu.memory_space<vmem>>, vector<8x128xf32>
      tpu.vector_store %arg9[%c0_34, %c0_35], %41 {strides = array<i32>} : memref<8x128xf32, #tpu.memory_space<vmem>>, vector<8x128xf32>,
    } else {
    }
    %c0 = arith.constant 0 : index
    %c0_1 = arith.constant 0 : index
    %c0_2 = arith.constant 0 : index
    %3 = vector.load %arg3[%c0, %c0_1, %c0_2] : memref<1x8x128xf32, #tpu.memory_space<vmem>>, vector<1x8x128xf32>
    %4 = vector.shape_cast %3 : vector<1x8x128xf32> to vector<8x128xf32>
    %cst = arith.constant 0.176776692 : f32
    %5 = vector.broadcast %cst : f32 to vector<8x128xf32>
    %6 = arith.mulf %4, %5 : vector<8x128xf32>
    %c0_3 = arith.constant 0 : index
    %c0_4 = arith.constant 0 : index
    %c0_5 = arith.constant 0 : index
    %7 = vector.load %arg4[%c0_3, %c0_4, %c0_5] : memref<1x8x128xf32, #tpu.memory_space<vmem>>, vector<1x8x128xf32>
    %8 = vector.shape_cast %7 : vector<1x8x128xf32> to vector<8x128xf32>
    %c0_6 = arith.constant 0 : index
    %c0_7 = arith.constant 0 : index
    %c0_8 = arith.constant 0 : index
    %9 = vector.load %arg5[%c0_6, %c0_7, %c0_8] : memref<1x8x128xf32, #tpu.memory_space<vmem>>, vector<1x8x128xf32>
    %10 = vector.shape_cast %9 : vector<1x8x128xf32> to vector<8x128xf32>
    %cst_9 = arith.constant dense<0.000000e+00> : vector<8x8xf32>
    %11 = tpu.matmul %6, %8, %cst_9 {dimension_numbers = #tpu.dot_dimension_numbers<[1], [1], [0], [0], [0, 0, 1, 0], [], []>} : vector<8x128xf32>, vector<8x128xf32>, vector<8x8xf32> -> vector<8x8xf32>
    %c0_10 = arith.constant 0 : index
    %c0_11 = arith.constant 0 : index
    %12 = vector.load %arg7[%c0_10, %c0_11] : memref<8x1xf32, #tpu.memory_space<vmem>>, vector<8x1xf32>
    %cst_12 = arith.constant dense<0xFF800000> : vector<8xf32>
    %13 = vector.multi_reduction <maximumf>, %11, %cst_12 [1] : vector<8x8xf32> to vector<8xf32>
    %14 = vector.shape_cast %13 : vector<8xf32> to vector<8x1xf32>
    %15 = arith.maximumf %12, %14 : vector<8x1xf32>
    %16 = arith.subf %12, %15 : vector<8x1xf32>
    %17 = math.exp %16 : vector<8x1xf32>
    %18 = vector.broadcast %15 : vector<8x1xf32> to vector<8x8xf32>
    %19 = arith.subf %11, %18 : vector<8x8xf32>
    %20 = math.exp %19 : vector<8x8xf32>
    %c0_13 = arith.constant 0 : index
    %c0_14 = arith.constant 0 : index
    %21 = vector.load %arg8[%c0_13, %c0_14] : memref<8x1xf32, #tpu.memory_space<vmem>>, vector<8x1xf32>
    %22 = arith.mulf %17, %21 : vector<8x1xf32>
    %cst_15 = arith.constant dense<0.000000e+00> : vector<8xf32>
    %23 = vector.multi_reduction <add>, %20, %cst_15 [1] : vector<8x8xf32> to vector<8xf32>
    %24 = vector.shape_cast %23 : vector<8xf32> to vector<8x1xf32>
    %25 = arith.addf %22, %24 : vector<8x1xf32>
    %c0_16 = arith.constant 0 : index
    %c0_17 = arith.constant 0 : index
    %26 = vector.load %arg8[%c0_16, %c0_17] : memref<8x1xf32, #tpu.memory_space<vmem>>, vector<8x1xf32>
    tpu.vector_store %arg8[%c0_16, %c0_17], %25 {strides = array<i32>} : memref<8x1xf32, #tpu.memory_space<vmem>>, vector<8x1xf32>,
    %c0_18 = arith.constant 0 : index
    %c0_19 = arith.constant 0 : index
    %27 = vector.load %arg9[%c0_18, %c0_19] : memref<8x128xf32, #tpu.memory_space<vmem>>, vector<8x128xf32>
    %28 = vector.broadcast %17 : vector<8x1xf32> to vector<8x128xf32>
    %29 = arith.mulf %28, %27 : vector<8x128xf32>
    %cst_20 = arith.constant dense<0.000000e+00> : vector<8x128xf32>
    %30 = tpu.matmul %20, %10, %cst_20 {dimension_numbers = #tpu.dot_dimension_numbers<[1], [0], [0], [1], [0, 0, 1, 1], [], []>} : vector<8x8xf32>, vector<8x128xf32>, vector<8x128xf32> -> vector<8x128xf32>
    %31 = arith.addf %29, %30 : vector<8x128xf32>
    %c0_21 = arith.constant 0 : index
    %c0_22 = arith.constant 0 : index
    %32 = vector.load %arg9[%c0_21, %c0_22] : memref<8x128xf32, #tpu.memory_space<vmem>>, vector<8x128xf32>
    tpu.vector_store %arg9[%c0_21, %c0_22], %31 {strides = array<i32>} : memref<8x128xf32, #tpu.memory_space<vmem>>, vector<8x128xf32>,
    %c0_23 = arith.constant 0 : index
    %c0_24 = arith.constant 0 : index
    %33 = vector.load %arg7[%c0_23, %c0_24] : memref<8x1xf32, #tpu.memory_space<vmem>>, vector<8x1xf32>
    tpu.vector_store %arg7[%c0_23, %c0_24], %15 {strides = array<i32>} : memref<8x1xf32, #tpu.memory_space<vmem>>, vector<8x1xf32>,
    %c0_i32_25 = arith.constant 0 : i32
    %34 = arith.cmpi eq, %arg2, %c0_i32_25 : i32
    %35 = arith.extui %34 : i1 to i32
    %c0_i32_26 = arith.constant 0 : i32
    %36 = arith.cmpi ne, %35, %c0_i32_26 : i32
    scf.if %36 {
      %c0_27 = arith.constant 0 : index
      %c0_28 = arith.constant 0 : index
      %37 = vector.load %arg8[%c0_27, %c0_28] : memref<8x1xf32, #tpu.memory_space<vmem>>, vector<8x1xf32>
      %38 = tpu.reciprocal %37 {approx = true} : vector<8x1xf32> -> vector<8x1xf32>
      %c0_29 = arith.constant 0 : index
      %c0_30 = arith.constant 0 : index
      %39 = vector.load %arg9[%c0_29, %c0_30] : memref<8x128xf32, #tpu.memory_space<vmem>>, vector<8x128xf32>
      %40 = vector.broadcast %38 : vector<8x1xf32> to vector<8x128xf32>
      %41 = arith.mulf %39, %40 : vector<8x128xf32>
      %c0_31 = arith.constant 0 : index
      %c0_32 = arith.constant 0 : index
      %c0_33 = arith.constant 0 : index
      %42 = vector.load %arg6[%c0_31, %c0_32, %c0_33] : memref<1x8x128xf32, #tpu.memory_space<vmem>>, vector<1x8x128xf32>
      %43 = vector.shape_cast %42 : vector<1x8x128xf32> to vector<8x128xf32>
      %44 = vector.shape_cast %41 : vector<8x128xf32> to vector<1x8x128xf32>
      tpu.vector_store %arg6[%c0_31, %c0_32, %c0_33], %44 {strides = array<i32>} : memref<1x8x128xf32, #tpu.memory_space<vmem>>, vector<1x8x128xf32>,
    } else {
    }
    return
  }
  func.func @transform_0(%arg0: i32, %arg1: i32, %arg2: i32) -> (i32, i32, i32) {
    %c0_i32 = arith.constant 0 : i32
    %c0_i32_0 = arith.constant 0 : i32
    return %arg0, %arg1, %c0_i32 : i32, i32, i32
  }
  func.func @transform_1(%arg0: i32, %arg1: i32, %arg2: i32) -> (i32, i32, i32) {
    %c0_i32 = arith.constant 0 : i32
    %c0_i32_0 = arith.constant 0 : i32
    return %arg0, %arg2, %c0_i32 : i32, i32, i32
  }
  func.func @transform_2(%arg0: i32, %arg1: i32, %arg2: i32) -> (i32, i32, i32) {
    %c0_i32 = arith.constant 0 : i32
    %c0_i32_0 = arith.constant 0 : i32
    return %arg0, %arg2, %c0_i32 : i32, i32, i32
  }
  func.func @transform_3(%arg0: i32, %arg1: i32, %arg2: i32) -> (i32, i32, i32) {
    %c0_i32 = arith.constant 0 : i32
    %c0_i32_0 = arith.constant 0 : i32
    return %arg0, %arg1, %c0_i32 : i32, i32, i32
  }
}

</mosaic_0001>

<bundles_post_ra>
// kernel: tpu_custom_call.1
= control target key start
LH: loop header
LB: loop body
LE: loop exit
PB: predicated region body
PF: predicated region fallthrough
CT: control target
= control target key end

     0   :  { %s1228_s0 = inlined_call_operand.hbm [shape: f32[2,8,128], index: 0, kind: input, shape index: {}]   ;;  %s1229_s1 = inlined_call_operand.hbm [shape: f32[2,8,128], index: 1, kind: input, shape index: {}]   ;;  %s1230_s2 = inlined_call_operand.hbm [shape: f32[2,8,128], index: 2, kind: input, shape index: {}]   ;;  %s1231_s3 = inlined_call_operand.hbm [shape: f32[2,8,128], index: 3, kind: output, shape index: {}]  }
   0x1   :  { %1237 = sst [smem:[#allocation18_spill]] %s1229_s1 }
   0x2   :  { %8 = vsyncpa [#allocation6], 0 }
   0x3   :  { %10 = vsyncpa [#allocation6 + $0x1], 0 }
   0x4   :  { %11 = vsyncpa [#allocation9], 0 }
   0x5   :  { %13 = vsyncpa [#allocation9 + $0x1], 0 }
   0x6   :  { %14 = vsyncpa [#allocation7], 0 }
   0x7   :  { %16 = vsyncpa [#allocation7 + $0x1], 0  ;;  %s957_s12 = smov 0   ;;  %s959_s13 = smov 0  }
   0x8   :  { %s961_s14 = smov 0   ;;  %s963_s15 = smov 0  }
   0x9   :  { %s965_s16 = smov 0   ;;  %s967_s17 = smov 0  }
   0xa LB: > { %1238 = sst [smem:[#allocation15_spill]] %s923_s16  ;;  %s988_s18 = sadd.s32 4294967295, %s927_s17   ;;  %s927_s17 = sphi %s967_s17, %s22_s17   ;;  %s923_s16 = sphi %s965_s16, %s1259_s16   ;;  %s919_s15 = sphi %s963_s15, %s1258_s15   ;;  %s915_s14 = sphi %s961_s14, %s1262_s14   ;;  %s911_s13 = sphi %s959_s13, %s1261_s13   ;;  %s907_s12 = sphi %s957_s12, %s1260_s12  }
   0xb   : > { %s634_s19 = sadd.s32 4294967294, %s927_s17   ;;  %s41_s20 = sadd.s32 1, %s923_s16 }
   0xc   : > { %s50_s21 = sadd.s32 1, %s915_s14  ;;  %p43_p0 = scmp.ge.s32.totalorder %s41_s20, 2 }
   0xd   : > { %p57_p1 = scmp.ne.s32.totalorder %s915_s14, %s911_s13  ;;  %p58_p2 = scmp.eq.s32.totalorder %s927_s17, 0 }
   0xe   : > { %p63_p3 = scmp.ne.s32.totalorder %s911_s13, %s907_s12  ;;  %s1264_s20 = smov (%p43_p0, %s41_s20), 0 }
   0xf   : > { %1239 = sst [smem:[#allocation16_spill]] %s1264_s20  ;;  %p1000_p4 = por %p58_p2, %p57_p1 }
  0x10   : > { %p64_p5 = scmp.eq.s32.totalorder %s988_s18, 0  ;;  %s45_s23 = ssub.s32 %s923_s16, %s1264_s20 }
  0x11   : > { %p145_p6 = scmp.eq.s32.totalorder %s988_s18, 1  ;;  %p48_p7 = scmp.eq.s32.totalorder %s45_s23, 0 }
  0x12   : > { %p1008_p8 = por %p64_p5, %p63_p3  ;;  %p151_p10 = scmp.eq.s32.totalorder %s634_s19, 1 }
  0x13   : > { %p1012_p9 = por %p145_p6, %p57_p1  ;;  %p689_p13 = scmp.lt.s32.totalorder %s927_s17, 2 }
  0x14   : > { %s1241_s24 = scalar_select %p1008_p8, 1, 0 }
  0x15   : > { %s1242_s25 = scalar_select %p1012_p9, 1, 0 }
  0x16   : > { %s1017_s26 = scalar_select %p48_p7, %s915_s14, %s50_s21  }
  0x17   : > { %p1019_p11 = por %p151_p10, %p63_p3  ;;  %s171_s28 = sand.u32 1, %s915_s14  }
  0x18   : > { %1243 = sst [smem:[#allocation17_spill]] %s1017_s26  ;;  %s1028_s29 = sshll.u32 %s171_s28, 3 }
  0x19   : > { %s1244_s27 = scalar_select %p1019_p11, 1, 0 }
  0x1a   : > { %s1031_s30 = sshll.u32 %s923_s16, 7  ;;  %p1035_p0 = pnand %p689_p13, %p1000_p4 }
  0x1b   : > { %s190_s5 = sand.u32 1, %s927_s17   ;;  %s1246_s1 = sld [smem:[#allocation18_spill]] }
  0x1c   : > { %s1245_s4 = scalar_select %p1035_p0, 1, 0 }
  0x1d   : > { %s194_s9 = scalar_lea.vmem [#allocation8], %s1028_s29  ;;  %s1051_s11 = scalar_lea.sflag [#allocation9], %s190_s5 }
  0x1e   : > { %s202_s10 = sshll.u32 %s194_s9, 4  ;;  %p1057_p4 = pneg %p1035_p0  ;;  %s1048_s10 = int_to_ptr.vmem [resolvable:$true] %s202_s10 }
  0x21   : > { %s1044_s8 = scalar_lea.hbm %s1246_s1, %s1031_s30  ;;  %s756_s6 = scalar_lea.hbm %s1246_s1, 256 }
  0x22   : > { %s751_s19 = scalar_lea.hbm %s1044_s8, 128  ;;  %p757_p7 = scmp.lt.u32.totalorder %s1044_s8, %s1246_s1 }
  0x23   : > { %p752_p3 = scmp.ne.s32.totalorder %s1044_s8, %s751_s19  ;;  %p758_p10 = scmp.lt.u32.totalorder %s756_s6, %s751_s19 }
  0x24   : > { %p760_p12 = scmp.lt.u32.totalorder %s751_s19, %s1044_s8 }
  0x25   : > { %p754_p5 = pnand %p1057_p4, %p752_p3  ;;  %p759_p13 = por %p758_p10, %p757_p7 }
  0x27   : > { %p755_p6 = pneg %p754_p5  ;;  %p761_p1 = por %p760_p12, %p759_p13 }
  0x29   : > { %p762_p2 = pnand %p761_p1, %p755_p6 }
  0x2b   : > { %765 = shalt.err (!%p762_p2)
}
  0x2c   : > { %s766_s5 = scalar_lea.vmem %s1048_s10, 128  ;;  %s929_s22 = smov [#allocation8]  }
  0x2d   : > { %p767_p3 = scmp.ne.s32.totalorder %s1048_s10, %s766_s5  ;;  %s771_s23 = sshll.u32 %s929_s22, 4  ;;  %s772_s23 = int_to_ptr.vmem [resolvable:$false] %s771_s23 }
  0x2e   : > { %s773_s7 = scalar_lea.vmem %s772_s23, 256  ;;  %p774_p9 = scmp.lt.s32.totalorder %s1048_s10, %s772_s23 }
  0x2f   : > { %p769_p5 = pnand %p767_p3, %p1057_p4  ;;  %p775_p8 = scmp.lt.s32.totalorder %s773_s7, %s766_s5 }
  0x31   : > { %p770_p11 = pneg %p769_p5  ;;  %p776_p7 = por %p775_p8, %p774_p9 }
  0x33   : > { %p777_p10 = pnand %p776_p7, %p770_p11 }
  0x35   : > { %780 = shalt.err (!%p777_p10)
}
  0x36   : > { %681 = dma.hbm_to_vmem [thread:$0]  (!%p1035_p0), %s1044_s8, 128, %s1048_s10, %s1051_s11  }
  0x37   : > { %p1248_p12 = scmp.lt.s32.totalorder %s927_s17, 3  ;;  %p1249_p1 = scmp.ge.s32.totalorder %s927_s17, 1 }
  0x38   : > { %s1093_s5 = scalar_lea.hbm %s1228_s0, %s1031_s30  ;;  %s175_s22 = scalar_lea.vmem [#allocation5], %s1028_s29 }
  0x39   : > { %p1085_p2 = pnand %p1249_p1, %p1248_p12  ;;  %s183_s23 = sshll.u32 %s175_s22, 4  ;;  %s1096_s23 = int_to_ptr.vmem [resolvable:$true] %s183_s23 }
  0x3a   : > { %s1102_s7 = scalar_lea.hbm %s1230_s2, %s1031_s30  ;;  %s172_s1 = scalar_lea.sflag [#allocation6], %s171_s28 }
  0x3b   : > { %s1250_s19 = scalar_select %p1085_p2, 1, 0 }
  0x3c   : > { %s781_s20 = scalar_lea.hbm %s1093_s5, 128  ;;  %s786_s16 = scalar_lea.hbm %s1228_s0, 256 }
  0x3d   : > { %p782_p8 = scmp.ne.s32.totalorder %s1093_s5, %s781_s20  ;;  %p787_p6 = scmp.lt.u32.totalorder %s1093_s5, %s1228_s0 }
  0x3e   : > { %p788_p13 = scmp.lt.u32.totalorder %s786_s16, %s781_s20  ;;  %p790_p5 = scmp.lt.u32.totalorder %s781_s20, %s1093_s5 }
  0x3f   : > { %p784_p9 = pnand %p782_p8, %p1057_p4 }
  0x40   : > { %p789_p3 = por %p788_p13, %p787_p6 }
  0x41   : > { %p785_p11 = pneg %p784_p9 }
  0x42   : > { %p791_p7 = por %p790_p5, %p789_p3 }
  0x44   : > { %p792_p10 = pnand %p791_p7, %p785_p11 }
  0x46   : > { %795 = shalt.err (!%p792_p10)
}
  0x47   : > { %s796_s28 = scalar_lea.vmem %s1096_s23, 128  ;;  %s930_s30 = smov [#allocation5]  }
  0x48   : > { %p797_p12 = scmp.ne.s32.totalorder %s1096_s23, %s796_s28  ;;  %s801_s8 = sshll.u32 %s930_s30, 4  ;;  %s802_s8 = int_to_ptr.vmem [resolvable:$false] %s801_s8 }
  0x49   : > { %s803_s26 = scalar_lea.vmem %s802_s8, 256  ;;  %p804_p9 = scmp.lt.s32.totalorder %s1096_s23, %s802_s8 }
  0x4a   : > { %p799_p1 = pnand %p797_p12, %p1057_p4  ;;  %p805_p2 = scmp.lt.s32.totalorder %s803_s26, %s796_s28 }
  0x4c   : > { %p800_p8 = pneg %p799_p1  ;;  %p806_p6 = por %p805_p2, %p804_p9 }
  0x4e   : > { %p807_p13 = pnand %p806_p6, %p800_p8 }
  0x50   : > { %810 = shalt.err (!%p807_p13)
}
  0x51   : > { %678 = dma.hbm_to_vmem [thread:$0]  (!%p1035_p0), %s1093_s5, 128, %s1096_s23, %s172_s1  }
  0x52   : > { %s213_s16 = scalar_lea.vmem [#allocation10], %s1028_s29  ;;  %s811_s10 = scalar_lea.hbm %s1102_s7, 128 }
  0x53   : > { %s221_s20 = sshll.u32 %s213_s16, 4  ;;  %p812_p11 = scmp.ne.s32.totalorder %s1102_s7, %s811_s10  ;;  %s222_s20 = int_to_ptr.vmem [resolvable:$true] %s221_s20 }
  0x54   : > { %s816_s22 = scalar_lea.hbm %s1230_s2, 256  ;;  %p817_p5 = scmp.lt.u32.totalorder %s1102_s7, %s1230_s2 }
  0x55   : > { %p814_p2 = pnand %p812_p11, %p1057_p4  ;;  %p818_p7 = scmp.lt.u32.totalorder %s816_s22, %s811_s10 }
  0x56   : > { %p820_p12 = scmp.lt.u32.totalorder %s811_s10, %s1102_s7 }
  0x57   : > { %p815_p3 = pneg %p814_p2  ;;  %p819_p10 = por %p818_p7, %p817_p5 }
  0x59   : > { %p821_p1 = por %p820_p12, %p819_p10 }
  0x5b   : > { %p822_p8 = pnand %p821_p1, %p815_p3 }
  0x5d   : > { %825 = shalt.err (!%p822_p8)
}
  0x5e   : > { %s826_s1 = scalar_lea.vmem %s222_s20, 128  ;;  %s931_s29 = smov [#allocation10]  }
  0x5f   : > { %p827_p9 = scmp.ne.s32.totalorder %s222_s20, %s826_s1  ;;  %s831_s5 = sshll.u32 %s931_s29, 4  ;;  %s832_s5 = int_to_ptr.vmem [resolvable:$false] %s831_s5 }
  0x60   : > { %s833_s23 = scalar_lea.vmem %s832_s5, 256  ;;  %p834_p11 = scmp.lt.s32.totalorder %s222_s20, %s832_s5 }
  0x61   : > { %p829_p6 = pnand %p827_p9, %p1057_p4  ;;  %p835_p2 = scmp.lt.s32.totalorder %s833_s23, %s826_s1 }
  0x63   : > { %p830_p13 = pneg %p829_p6  ;;  %p836_p0 = por %p835_p2, %p834_p11 }
  0x65   : > { %p837_p5 = pnand %p836_p0, %p830_p13 }
  0x67   : > { %840 = shalt.err (!%p837_p5)
}
  0x68   : > { %p1251_p7 = scmp.ne.s32.totalorder %s1245_s4, 0  ;;  %p1252_p3 = scmp.ne.s32.totalorder %s1250_s19, 0 }
  0x69   : > { %s1149_s21 = sand.u32 (!%p1252_p3), 1, %s911_s13   ;;  %p1253_p0 = scmp.ne.s32.totalorder (!%p1252_p3), %s1241_s24, 0 }
  0x6a   : > { %684 = dma.hbm_to_vmem [thread:$0]  (!%p1251_p7), %s1102_s7, 128, %s222_s20, %s1051_s11  }
  0x6b   : > { %230 = sbr.rel (%p1252_p3) target bundleno = 932 (0x3a4), region = 32  ;;  %s1152_s8 = sshll.u32 (!%p1252_p3), %s1149_s21, 3 }
  0x6c   : > { %s233_s26 = scalar_lea.sflag (!%p1252_p3), [#allocation6], %s1149_s21  ;;  %s236_s16 = scalar_lea.vmem (!%p1252_p3), [#allocation5], %s1152_s8 }
  0x72   : > { %894 = dma.done.wait (%p1253_p0), %s233_s26, 128  }
  0x73   : > { %896 = vsyncadd (%p1253_p0), %s233_s26, 4294967168  ;;  %s241_s4 = sand.u32 1, %s988_s18   ;;  %s245_s19 = scalar_lea.vmem [#allocation8], %s1152_s8 }
  0x74   : > { %s242_s11 = scalar_lea.sflag [#allocation9], %s241_s4 }
  0x75   : > { %898 = dma.done.wait (%p1253_p0), %s242_s11, 256  }
  0x76   : > { %900 = vsyncadd (%p1253_p0), %s242_s11, 4294967040  ;;  %vm291_vm0 = vcmask 7168   ;;  %v932_v0 = vmov 0.0   ;;  %vm933_vm1 = vmmov 0   ;;  %v297_v1 = vld [vmem:[%s245_s19] sm:$0xff]  ;;  %v295_v2 = vld [vmem:[%s236_s16] sm:$0xff] }
  0x77   : > { %293 = vst.msk [vmem:[#allocation3] sm:$0xff] %vm291_vm0, %v932_v0  ;;  %657 = vmatprep.subr.mxu0 %v932_v0  ;;  %659 = vmatprep.mubr.msk.f32.mxu0 %vm933_vm1, %v932_v0  ;;  %v296_v3 = vmul.f32 0.17677669, %v295_v2  ;;  %v934_v4 = vmov -inf   ;;  %vm370_vm2 = vcmask 64512   ;;  %v935_v8 = vmov 0  }
  0x78   : > { %662 = vmatprep.subr.mxu1 %v932_v0  ;;  %664 = vmatprep.mubr.msk.f32.mxu1 %vm933_vm1, %v932_v0  ;;  %292 = vst.msk [vmem:[#allocation2] sm:$0xff] %vm291_vm0, %v934_v4  ;;  %s254_s18 = scalar_lea.vmem [#allocation10], %s1152_s8  ;;  %s650_s24 = sshll.u32 %s919_s15, 7 }
  0x79   : > { %658 = vmatpush3.xpose.msra.mxu0 %v297_v1  ;;  %743 = vset.pattern.permute.xlu0 %v935_v8  ;;  %v298_v13 = vld [vmem:[%s254_s18] sm:$0xff]  ;;  %s286_s7 = scalar_lea.vmem [#allocation11], %s1152_s8  ;;  %s1179_s9 = scalar_lea.hbm %s1231_s3, %s650_s24 }
  0x7a   : > { %744 = vset.pattern.permute.xlu1 %v935_v8  ;;  %663 = vmatpush3.msra.mxu1 %v298_v13  ;;  %s505_s20 = sshll.u32 %s286_s7, 4  ;;  %s491_s22 = scalar_lea.sflag [#allocation7], %s1149_s21  ;;  %s1181_s20 = int_to_ptr.vmem [resolvable:$true] %s505_s20 }
  0x7b   : > { %s841_s28 = scalar_lea.vmem %s1181_s20, 128  ;;  %p1254_p10 = scmp.ne.s32.totalorder %s1242_s25, 0 }
  0x7c   : > { %660 = vmatmul.mubr.f32.vlgmr.msra.gmra.mrb[0].mxu0 %v296_v3  ;;  %p842_p4 = scmp.ne.s32.totalorder %s1181_s20, %s841_s28  ;;  %s936_s15 = smov [#allocation11]  }
  0x7d   : > { %s845_s30 = sshll.u32 %s936_s15, 4  ;;  %s846_s30 = int_to_ptr.vmem [resolvable:$false] %s845_s30 }
  0x7e   : > { %v386_v21 = vld [vmem:[#allocation3] sm:$0xff]  ;;  %p843_p12 = pnand %p842_p4, %p1254_p10  ;;  %s847_s1 = scalar_lea.vmem %s846_s30, 256 }
  0x7f   : > { %v369_v9 = vld [vmem:[#allocation2] sm:$0xff]  ;;  %p848_p8 = scmp.lt.s32.totalorder %s1181_s20, %s846_s30  ;;  %p849_p9 = scmp.lt.s32.totalorder %s847_s1, %s841_s28 }
  0x80   : > { %p844_p1 = pneg %p843_p12 }
  0x81   : > { %p850_p6 = por %p849_p9, %p848_p8 }
  0x83   : > { %p851_p13 = pnand %p850_p6, %p844_p1 }
 0x14f   : > { %v365_v5 = vpop.f32.mrb[0].mxu0 }
 0x150   : > { %v661_v6 = vpop.f32.mrb[1].mxu0  ;;  %v371_v7 = vsel %vm370_vm2, %v365_v5, -inf }
 0x151   : > { %372 = vmax.xlane.f32.xlu0 %v371_v7 }
 0x1de   : > { %v373_v10 = vpop.xlane.xlu0 %372 }
 0x1df   : > { %v374_v11 = vmax.f32 %v369_v9, %v373_v10 }
 0x1e1   : > { %v375_v12 = vsub.f32 %v369_v9, %v374_v11  ;;  %476 = vst.msk [vmem:[#allocation2] sm:$0xff] %vm291_vm0, %v374_v11  ;;  %380 = vperm.xlu0 %743, %v374_v11  }
 0x1e3   : > { %v376_v19 = vmul.f32 1.442695, %v375_v12 }
 0x260   : > { %v381_v14 = vpop.permute.xlu0 %380 }
 0x261   : > { %v383_v15 = vsub.f32 %v365_v5, %v381_v14 }
 0x263   : > { %v384_v16 = vmul.f32 1.442695, %v383_v15 }
 0x265   : > { %745 = vpow2.f32 %v384_v16 }
 0x266   : > { %747 = vpow2.f32 %v376_v19 }
 0x26f   : > { %v746_v17 = vpop.eup %745 }
 0x270   : > { %665 = vmatmul.mubr.msk.f32.vlgmr.msra.gmra.mrb[0].mxu1 %vm370_vm2, %v746_v17  ;;  %v388_v18 = vsel %vm370_vm2, %v746_v17, 0.0  ;;  %v748_v20 = vpop.eup %747 }
 0x271   : > { %389 = vadd.xlane.f32.xlu1 %v388_v18  ;;  %v387_v22 = vmul.f32 %v748_v20, %v386_v21 }
 0x282   : > { %397 = vperm.xlu1 %744, %v748_v20  }
 0x2fe   : > { %v390_v23 = vpop.xlane.xlu1 %389 }
 0x2ff   : > { %v391_v24 = vadd.f32 %v390_v23, %v387_v22 }
 0x301   : > { %393 = vst.msk [vmem:[#allocation3] sm:$0xff] %vm291_vm0, %v391_v24 }
 0x302   : > { %v398_v29 = vpop.permute.xlu1 %397 }
 0x303   : > { %v400_v30 = vmul.f32 0.0, %v398_v29 }
 0x308   : > { %v480_v25 = vld [vmem:[#allocation3] sm:$0xff] }
 0x309   : > { %749 = vrcp.f32 %v480_v25 }
 0x313   : > { %v750_v26 = vpop.eup %749 }
 0x314   : > { %485 = vperm.xlu1 %744, %v750_v26  }
 0x343   : > { %v470_v27 = vpop.f32.mrb[0].mxu1 }
 0x344   : > { %v666_v28 = vpop.f32.mrb[1].mxu1  ;;  %v474_v31 = vadd.f32 %v470_v27, %v400_v30 }
 0x393   : > { %v486_v32 = vpop.permute.xlu1 %485 }
 0x394   : > { %v488_v33 = vmul.f32 %v486_v32, %v474_v31 }
 0x396   : > { %489 = vst [vmem:[%s286_s7] sm:$0xff] %v488_v33 }
 0x397   : > { %854 = shalt.err (!%p851_p13)
}
 0x398   : > { %s855_s29 = scalar_lea.hbm %s1179_s9, 128  ;;  %s859_s21 = scalar_lea.hbm %s1231_s3, 256 }
 0x399   : > { %p856_p11 = scmp.ne.s32.totalorder %s1179_s9, %s855_s29  ;;  %p860_p7 = scmp.lt.u32.totalorder %s1179_s9, %s1231_s3 }
 0x39a   : > { %p861_p3 = scmp.lt.u32.totalorder %s859_s21, %s855_s29  ;;  %p863_p4 = scmp.lt.u32.totalorder %s855_s29, %s1179_s9 }
 0x39b   : > { %p857_p2 = pnand %p856_p11, %p1254_p10 }
 0x39c   : > { %p862_p0 = por %p861_p3, %p860_p7 }
 0x39d   : > { %p858_p5 = pneg %p857_p2 }
 0x39e   : > { %p864_p12 = por %p863_p4, %p862_p0 }
 0x3a0   : > { %p865_p1 = pnand %p864_p12, %p858_p5 }
 0x3a2   : > { %868 = shalt.err (!%p865_p1)
}
 0x3a3   : > { %673 = dma.vmem_to_hbm [thread:$0]  (%p1254_p10), %s1181_s20, 128, %s1179_s9, %s491_s22  }
 0x3a4 PF: > { %s517_s16 = sand.u32 1, %s907_s12   ;;  %p1255_p8 = scmp.ne.s32.totalorder %s1244_s27, 0 }
 0x3a5   : > { %p1256_p9 = scmp.ge.s32.totalorder %s927_s17, 2  ;;  %s518_s4 = scalar_lea.sflag [#allocation7], %s517_s16 }
 0x3a7   : > { %p686_p6 = pnand %p1256_p9, %p1255_p8 }
 0x3a9   : > { %902 = dma.done.wait (!%p686_p6), %s518_s4, 128  }
 0x3aa   : > { %904 = vsyncadd (!%p686_p6), %s518_s4, 4294967168  ;;  %s22_s17 = sadd.s32 1, %s927_s17   ;;  %s1257_s25 = sld [smem:[#allocation17_spill]] }
 0x3ab   : > { %p19_p13 = scmp.ge.s32.totalorder %s22_s17, 4   ;;  %s1258_s15 = sld [smem:[#allocation15_spill]] }
 0x3ac   : > { %s1259_s16 = sld [smem:[#allocation16_spill]]  ;;  %s1260_s12 = smov %s911_s13 }
 0x3ad   : > { %s1261_s13 = smov %s915_s14  ;;  %21 = sbr.rel (!%p19_p13) target bundleno = 10 (0xa), region = 109 }
 0x3b0   : > { %s1262_s14 = smov %s1257_s25 }
 0x3b4   :  { %523 = vsyncpa [#allocation6], 1 }
 0x3b5   :  { %525 = vsyncpa [#allocation6 + $0x1], 1 }
 0x3b6   :  { %526 = vsyncpa [#allocation9], 1 }
 0x3b7   :  { %528 = vsyncpa [#allocation9 + $0x1], 1 }
 0x3b8   :  { %529 = vsyncpa [#allocation7], 1 }
 0x3b9   :  { %531 = vsyncpa [#allocation7 + $0x1], 1 }

</bundles_post_ra>
